<compile_context>
chip_gen: v7x
topology: tpu7x:2x2x1
jax: 0.10.0
libtpu: 0.0.40
codegen_flags: <defaults>
</compile_context>

<pallas_src>
import jax
import jax.numpy as jnp
from jax.experimental import pallas as pl
from jax.experimental.pallas import tpu as pltpu

KSIZE = 9
PAD = KSIZE // 2          # 4
HALO = KSIZE - 1          # 8


def _win9_lane(a, out_w):
    """9-tap sliding window sum along the last (lane) axis via log-doubling.

    a: (..., n) -> (..., out_w) with out[..., w] = sum_{j=0..8} a[..., w+j].
    """
    n = a.shape[-1]
    s2 = a[..., 0:n - 1] + a[..., 1:n]           # window 2
    s4 = s2[..., 0:n - 3] + s2[..., 2:n - 1]     # window 4
    s8 = s4[..., 0:n - 7] + s4[..., 4:n - 3]     # window 8
    return s8[..., 0:out_w] + a[..., 8:8 + out_w]  # window 9


def _win9_head(a, out_h):
    """9-tap sliding window sum along the leading axis (free address shifts)."""
    n = a.shape[0]
    s2 = a[0:n - 1] + a[1:n]
    s4 = s2[0:n - 3] + s2[2:n - 1]
    s8 = s4[0:n - 7] + s4[4:n - 3]
    return s8[0:out_h] + a[8:8 + out_h]


def _sparse_avg_pool_kernel(cur_ref, halo_ref, o_ref):
    # cur_ref : (TH,   GB, Wp)  padded rows [t*TH, t*TH+TH)
    # halo_ref: (HALO, GB, Wp)  padded rows [t*TH+TH, t*TH+TH+8)  (bottom halo)
    # o_ref   : (TH,   GB, W)
    TH, _, W = o_ref.shape

    xp = jnp.concatenate([cur_ref[...], halo_ref[...]], axis=0).astype(jnp.float32)
    cp = (xp > 0).astype(jnp.float32)

    # Row pass (W on lanes), then column pass (H on leading dim).
    acc = _win9_head(_win9_lane(xp, W), TH)      # 9x9 window sum
    cnt = _win9_head(_win9_lane(cp, W), TH)      # 9x9 window positive-count

    # cnt == 0 -> multiply by 1/1, i.e. keep the raw (non-positive) window sum,
    # exactly matching the masked in-place division of the PyTorch module.
    out = acc * pl.reciprocal(jnp.maximum(cnt, 1.0), approx=False)
    o_ref[...] = out.astype(o_ref.dtype)


def _round_up(a, b):
    return ((a + b - 1) // b) * b


def sparse_avg_pooling(x):
    """x: (N, C, H, W) float array. Returns (N, C, H, W)."""
    N, C, H, W = x.shape
    G = N * C
    Wp = W + 2 * PAD

    # ---- tiling choices ----------------------------------------------------
    Ho = _round_up(H, 8)                       # computed output height (mult of 8)
    TH = Ho
    for cand in (128, 64, 32, 16, 8):          # prefer >=2 H tiles (megacore)
        if Ho % cand == 0 and Ho // cand >= 2:
            TH = cand
            break

    if G <= 8:
        Gp = G
        GB = G                                 # full-dim block is allowed
    else:
        Gp = _round_up(G, 8)
        GB = 8
        for cand in (64, 32, 16, 8):
            if Gp % cand == 0:
                GB = cand
                break

    # Keep double-buffered blocks + f32 intermediates well under the smallest
    # (v5e, 16 MiB) default scoped-VMEM limit.
    budget = 12 * 1024 * 1024

    def _unit(th, gb):                          # ~8 live f32 tile-sized arrays
        return 8 * (th + HALO) * gb * Wp * 4

    while _unit(TH, GB) > budget and GB > 8:
        GB //= 2
    while _unit(TH, GB) > budget and TH > 8:
        TH //= 2

    T = Ho // TH
    HP = _round_up(Ho + HALO, TH)              # padded input height (mult of TH and 8)

    # ---- layout: (H, G, W) -------------------------------------------------
    xg = jnp.transpose(x.reshape(G, H, W), (1, 0, 2))                    # (H, G, W)
    xpad = jnp.pad(xg, ((PAD, HP - H - PAD), (0, Gp - G), (PAD, PAD)))   # (HP, Gp, Wp)

    out = pl.pallas_call(
        _sparse_avg_pool_kernel,
        out_shape=jax.ShapeDtypeStruct((Ho, Gp, W), x.dtype),
        grid=(T, Gp // GB),
        in_specs=[
            # current tile: padded rows [t*TH, t*TH + TH)
            pl.BlockSpec((TH, GB, Wp), lambda t, g: (t, g, 0)),
            # bottom halo: padded rows [t*TH + TH, t*TH + TH + 8)
            pl.BlockSpec((HALO, GB, Wp),
                         lambda t, g: ((t + 1) * (TH // HALO), g, 0)),
        ],
        out_specs=pl.BlockSpec((TH, GB, W), lambda t, g: (t, g, 0)),
        compiler_params=pltpu.CompilerParams(
            dimension_semantics=("parallel", "parallel")),
    )(xpad, xpad)

    out = out[:H, :G, :]                        # drop padded rows / channels
    return jnp.transpose(out, (1, 0, 2)).reshape(N, C, H, W)


def _reference(x):
    """Pure-JAX reference using reduce_window (independent of the kernel)."""
    sum_pool = lambda a: jax.lax.reduce_window(
        a, 0.0, jax.lax.add,
        window_dimensions=(1, 1, KSIZE, KSIZE),
        window_strides=(1, 1, 1, 1),
        padding=((0, 0), (0, 0), (PAD, PAD), (PAD, PAD)))
    num_pool = sum_pool((x > 0).astype(x.dtype))
    avg_pool = sum_pool(x)
    return jnp.where(num_pool > 0,
                     avg_pool / jnp.where(num_pool > 0, num_pool, 1.0),
                     avg_pool)


if __name__ == "__main__":
    key = jax.random.PRNGKey(0)
    k1, k2 = jax.random.split(key)
    # Small shapes consistent with the module: N=2, C=4, H=W=16.
    # Sparse input (many exact zeros, some negatives) exercises both the
    # count>0 division path and the "keep raw sum" path.
    v = jax.random.normal(k1, (2, 4, 16, 16), dtype=jnp.float32)
    keep = jax.random.uniform(k2, (2, 4, 16, 16)) < 0.3
    x = jnp.where(keep, v, 0.0)

    y = sparse_avg_pooling(x)
    y = jax.block_until_ready(y)

    y_ref = _reference(x)
    assert y.shape == x.shape and y.dtype == x.dtype
    assert jnp.allclose(y, y_ref, atol=1e-4, rtol=1e-4)

    print("KERNEL_OK")
</pallas_src>

<mosaic_0001>
module attributes {stable_mosaic.version = 11 : i64} {
  func.func @_sparse_avg_pool_kernel(%arg0: i32, %arg1: i32, %arg2: memref<8x8x24xf32, #tpu.memory_space<vmem>>, %arg3: memref<8x8x24xf32, #tpu.memory_space<vmem>>, %arg4: memref<8x8x16xf32, #tpu.memory_space<vmem>>) attributes {dimension_semantics = [#tpu.dimension_semantics<parallel>, #tpu.dimension_semantics<parallel>], iteration_bounds = array<i64: 2, 1>, scalar_prefetch = 0 : i64, scratch_operands = 0 : i64, tpu.core_type = #tpu.core_type<tc>, window_params = [{transform_indices = @transform_0, window_bounds = array<i64: 8, 8, 24>}, {transform_indices = @transform_1, window_bounds = array<i64: 8, 8, 24>}, {transform_indices = @transform_2, window_bounds = array<i64: 8, 8, 16>}]} {
    %c0 = arith.constant 0 : index
    %c0_0 = arith.constant 0 : index
    %c0_1 = arith.constant 0 : index
    %0 = vector.load %arg2[%c0, %c0_0, %c0_1] : memref<8x8x24xf32, #tpu.memory_space<vmem>>, vector<8x8x24xf32>
    %c0_2 = arith.constant 0 : index
    %c0_3 = arith.constant 0 : index
    %c0_4 = arith.constant 0 : index
    %1 = vector.load %arg3[%c0_2, %c0_3, %c0_4] : memref<8x8x24xf32, #tpu.memory_space<vmem>>, vector<8x8x24xf32>
    %2 = tpu.concatenate %0, %1 in 0 : vector<8x8x24xf32>, vector<8x8x24xf32> -> vector<16x8x24xf32>
    %cst = arith.constant 0.000000e+00 : f32
    %3 = vector.broadcast %cst : f32 to vector<16x8x24xf32>
    %4 = arith.cmpf ogt, %2, %3 : vector<16x8x24xf32>
    %5 = arith.extui %4 : vector<16x8x24xi1> to vector<16x8x24xi32>
    %6 = arith.sitofp %5 : vector<16x8x24xi32> to vector<16x8x24xf32>
    %7 = vector.extract_strided_slice %2 {offsets = [0, 0, 0], sizes = [16, 8, 23], strides = [1, 1, 1]} : vector<16x8x24xf32> to vector<16x8x23xf32>
    %8 = vector.extract_strided_slice %2 {offsets = [0, 0, 1], sizes = [16, 8, 23], strides = [1, 1, 1]} : vector<16x8x24xf32> to vector<16x8x23xf32>
    %9 = arith.addf %7, %8 : vector<16x8x23xf32>
    %10 = vector.extract_strided_slice %9 {offsets = [0, 0, 0], sizes = [16, 8, 21], strides = [1, 1, 1]} : vector<16x8x23xf32> to vector<16x8x21xf32>
    %11 = vector.extract_strided_slice %9 {offsets = [0, 0, 2], sizes = [16, 8, 21], strides = [1, 1, 1]} : vector<16x8x23xf32> to vector<16x8x21xf32>
    %12 = arith.addf %10, %11 : vector<16x8x21xf32>
    %13 = vector.extract_strided_slice %12 {offsets = [0, 0, 0], sizes = [16, 8, 17], strides = [1, 1, 1]} : vector<16x8x21xf32> to vector<16x8x17xf32>
    %14 = vector.extract_strided_slice %12 {offsets = [0, 0, 4], sizes = [16, 8, 17], strides = [1, 1, 1]} : vector<16x8x21xf32> to vector<16x8x17xf32>
    %15 = arith.addf %13, %14 : vector<16x8x17xf32>
    %16 = vector.extract_strided_slice %15 {offsets = [0, 0, 0], sizes = [16, 8, 16], strides = [1, 1, 1]} : vector<16x8x17xf32> to vector<16x8x16xf32>
    %17 = vector.extract_strided_slice %2 {offsets = [0, 0, 8], sizes = [16, 8, 16], strides = [1, 1, 1]} : vector<16x8x24xf32> to vector<16x8x16xf32>
    %18 = arith.addf %16, %17 : vector<16x8x16xf32>
    %19 = vector.extract_strided_slice %18 {offsets = [0, 0, 0], sizes = [15, 8, 16], strides = [1, 1, 1]} : vector<16x8x16xf32> to vector<15x8x16xf32>
    %20 = vector.extract_strided_slice %18 {offsets = [1, 0, 0], sizes = [15, 8, 16], strides = [1, 1, 1]} : vector<16x8x16xf32> to vector<15x8x16xf32>
    %21 = arith.addf %19, %20 : vector<15x8x16xf32>
    %22 = vector.extract_strided_slice %21 {offsets = [0, 0, 0], sizes = [13, 8, 16], strides = [1, 1, 1]} : vector<15x8x16xf32> to vector<13x8x16xf32>
    %23 = vector.extract_strided_slice %21 {offsets = [2, 0, 0], sizes = [13, 8, 16], strides = [1, 1, 1]} : vector<15x8x16xf32> to vector<13x8x16xf32>
    %24 = arith.addf %22, %23 : vector<13x8x16xf32>
    %25 = vector.extract_strided_slice %24 {offsets = [0, 0, 0], sizes = [9, 8, 16], strides = [1, 1, 1]} : vector<13x8x16xf32> to vector<9x8x16xf32>
    %26 = vector.extract_strided_slice %24 {offsets = [4, 0, 0], sizes = [9, 8, 16], strides = [1, 1, 1]} : vector<13x8x16xf32> to vector<9x8x16xf32>
    %27 = arith.addf %25, %26 : vector<9x8x16xf32>
    %28 = vector.extract_strided_slice %27 {offsets = [0, 0, 0], sizes = [8, 8, 16], strides = [1, 1, 1]} : vector<9x8x16xf32> to vector<8x8x16xf32>
    %29 = vector.extract_strided_slice %18 {offsets = [8, 0, 0], sizes = [8, 8, 16], strides = [1, 1, 1]} : vector<16x8x16xf32> to vector<8x8x16xf32>
    %30 = arith.addf %28, %29 : vector<8x8x16xf32>
    %31 = vector.extract_strided_slice %6 {offsets = [0, 0, 0], sizes = [16, 8, 23], strides = [1, 1, 1]} : vector<16x8x24xf32> to vector<16x8x23xf32>
    %32 = vector.extract_strided_slice %6 {offsets = [0, 0, 1], sizes = [16, 8, 23], strides = [1, 1, 1]} : vector<16x8x24xf32> to vector<16x8x23xf32>
    %33 = arith.addf %31, %32 : vector<16x8x23xf32>
    %34 = vector.extract_strided_slice %33 {offsets = [0, 0, 0], sizes = [16, 8, 21], strides = [1, 1, 1]} : vector<16x8x23xf32> to vector<16x8x21xf32>
    %35 = vector.extract_strided_slice %33 {offsets = [0, 0, 2], sizes = [16, 8, 21], strides = [1, 1, 1]} : vector<16x8x23xf32> to vector<16x8x21xf32>
    %36 = arith.addf %34, %35 : vector<16x8x21xf32>
    %37 = vector.extract_strided_slice %36 {offsets = [0, 0, 0], sizes = [16, 8, 17], strides = [1, 1, 1]} : vector<16x8x21xf32> to vector<16x8x17xf32>
    %38 = vector.extract_strided_slice %36 {offsets = [0, 0, 4], sizes = [16, 8, 17], strides = [1, 1, 1]} : vector<16x8x21xf32> to vector<16x8x17xf32>
    %39 = arith.addf %37, %38 : vector<16x8x17xf32>
    %40 = vector.extract_strided_slice %39 {offsets = [0, 0, 0], sizes = [16, 8, 16], strides = [1, 1, 1]} : vector<16x8x17xf32> to vector<16x8x16xf32>
    %41 = vector.extract_strided_slice %6 {offsets = [0, 0, 8], sizes = [16, 8, 16], strides = [1, 1, 1]} : vector<16x8x24xf32> to vector<16x8x16xf32>
    %42 = arith.addf %40, %41 : vector<16x8x16xf32>
    %43 = vector.extract_strided_slice %42 {offsets = [0, 0, 0], sizes = [15, 8, 16], strides = [1, 1, 1]} : vector<16x8x16xf32> to vector<15x8x16xf32>
    %44 = vector.extract_strided_slice %42 {offsets = [1, 0, 0], sizes = [15, 8, 16], strides = [1, 1, 1]} : vector<16x8x16xf32> to vector<15x8x16xf32>
    %45 = arith.addf %43, %44 : vector<15x8x16xf32>
    %46 = vector.extract_strided_slice %45 {offsets = [0, 0, 0], sizes = [13, 8, 16], strides = [1, 1, 1]} : vector<15x8x16xf32> to vector<13x8x16xf32>
    %47 = vector.extract_strided_slice %45 {offsets = [2, 0, 0], sizes = [13, 8, 16], strides = [1, 1, 1]} : vector<15x8x16xf32> to vector<13x8x16xf32>
    %48 = arith.addf %46, %47 : vector<13x8x16xf32>
    %49 = vector.extract_strided_slice %48 {offsets = [0, 0, 0], sizes = [9, 8, 16], strides = [1, 1, 1]} : vector<13x8x16xf32> to vector<9x8x16xf32>
    %50 = vector.extract_strided_slice %48 {offsets = [4, 0, 0], sizes = [9, 8, 16], strides = [1, 1, 1]} : vector<13x8x16xf32> to vector<9x8x16xf32>
    %51 = arith.addf %49, %50 : vector<9x8x16xf32>
    %52 = vector.extract_strided_slice %51 {offsets = [0, 0, 0], sizes = [8, 8, 16], strides = [1, 1, 1]} : vector<9x8x16xf32> to vector<8x8x16xf32>
    %53 = vector.extract_strided_slice %42 {offsets = [8, 0, 0], sizes = [8, 8, 16], strides = [1, 1, 1]} : vector<16x8x16xf32> to vector<8x8x16xf32>
    %54 = arith.addf %52, %53 : vector<8x8x16xf32>
    %cst_5 = arith.constant 1.000000e+00 : f32
    %55 = vector.broadcast %cst_5 : f32 to vector<8x8x16xf32>
    %56 = arith.maximumf %54, %55 : vector<8x8x16xf32>
    %57 = tpu.reciprocal %56 : vector<8x8x16xf32> -> vector<8x8x16xf32>
    %58 = arith.mulf %30, %57 : vector<8x8x16xf32>
    %c0_6 = arith.constant 0 : index
    %c0_7 = arith.constant 0 : index
    %c0_8 = arith.constant 0 : index
    %59 = vector.load %arg4[%c0_6, %c0_7, %c0_8] : memref<8x8x16xf32, #tpu.memory_space<vmem>>, vector<8x8x16xf32>
    tpu.vector_store %arg4[%c0_6, %c0_7, %c0_8], %58 {strides = array<i32>} : memref<8x8x16xf32, #tpu.memory_space<vmem>>, vector<8x8x16xf32>,
    return
  }
  func.func @transform_0(%arg0: i32, %arg1: i32) -> (i32, i32, i32) {
    %c0_i32 = arith.constant 0 : i32
    %c0_i32_0 = arith.constant 0 : i32
    return %arg0, %arg1, %c0_i32 : i32, i32, i32
  }
  func.func @transform_1(%arg0: i32, %arg1: i32) -> (i32, i32, i32) {
    %c1_i32 = arith.constant 1 : i32
    %0 = arith.addi %arg0, %c1_i32 : i32
    %c1_i32_0 = arith.constant 1 : i32
    %1 = arith.muli %0, %c1_i32_0 : i32
    %c0_i32 = arith.constant 0 : i32
    %c0_i32_1 = arith.constant 0 : i32
    return %1, %arg1, %c0_i32 : i32, i32, i32
  }
  func.func @transform_2(%arg0: i32, %arg1: i32) -> (i32, i32, i32) {
    %c0_i32 = arith.constant 0 : i32
    %c0_i32_0 = arith.constant 0 : i32
    return %arg0, %arg1, %c0_i32 : i32, i32, i32
  }
}

</mosaic_0001>

<bundles_post_ra>
// kernel: tpu_custom_call.1
= control target key start
LH: loop header
LB: loop body
LE: loop exit
PB: predicated region body
PF: predicated region fallthrough
CT: control target
= control target key end

     0   :  { %s2596_s0 = inlined_call_operand.hbm [shape: f32[24,8,24], index: 0, kind: input, shape index: {}]   ;;  %s2597_s1 = inlined_call_operand.hbm [shape: f32[24,8,24], index: 1, kind: input, shape index: {}]   ;;  %s2598_s2 = inlined_call_operand.hbm [shape: f32[16,8,16], index: 2, kind: output, shape index: {}]  }
   0x1   :  { %2612 = sst [smem:[#allocation22_spill]] %s2596_s0 }
   0x2   :  { %7 = vsyncpa [#allocation3], 0 }
   0x3   :  { %9 = vsyncpa [#allocation3 + $0x1], 0 }
   0x4   :  { %10 = vsyncpa [#allocation6], 0 }
   0x5   :  { %12 = vsyncpa [#allocation6 + $0x1], 0 }
   0x6   :  { %13 = vsyncpa [#allocation4], 0 }
   0x7   :  { %15 = vsyncpa [#allocation4 + $0x1], 0  ;;  %s1610_s9 = smov 0   ;;  %s1612_s10 = smov 0  }
   0x8   :  { %s1614_s11 = smov 0   ;;  %s1616_s12 = smov 0  }
   0x9   :  { %s1618_s13 = smov 0   ;;  %s1620_s14 = smov 0  }
   0xa   :  { %s1622_s15 = smov 0   ;;  %s1624_s16 = smov 0  }
   0xb   :  { %s1626_s17 = smov 0  }
   0xc LB: > { %s1144_s18 = sadd.s32 4294967295, %s1581_s17   ;;  %s1145_s19 = sadd.s32 4294967294, %s1581_s17   ;;  %s1581_s17 = sphi %s1626_s17, %s21_s17   ;;  %s1577_s16 = sphi %s1624_s16, %s2661_s16   ;;  %s1573_s15 = sphi %s1622_s15, %s2660_s15   ;;  %s1569_s14 = sphi %s1620_s14, %s2659_s14   ;;  %s1565_s13 = sphi %s1618_s13, %s2658_s13   ;;  %s1561_s12 = sphi %s1616_s12, %s2657_s12   ;;  %s1557_s11 = sphi %s1614_s11, %s2656_s11   ;;  %s1553_s10 = sphi %s1612_s10, %s2655_s10   ;;  %s1549_s9 = sphi %s1610_s9, %s2654_s9  }
   0xd   : > { %s33_s20 = sadd.s32 1, %s1577_s16  ;;  %s42_s21 = sadd.s32 1, %s1569_s14 }
   0xe   : > { %p35_p0 = scmp.ge.s32.totalorder %s33_s20, 2  ;;  %p49_p1 = scmp.ne.s32.totalorder %s1569_s14, %s1565_s13 }
   0xf   : > { %p2600_p2 = scmp.eq.s32.totalorder %s1581_s17, 0  ;;  %p55_p3 = scmp.ne.s32.totalorder %s1565_s13, %s1561_s12 }
  0x10   : > { %s1664_s22 = scalar_select %p35_p0, 0, %s33_s20  }
  0x11   : > { %p1671_p4 = por %p2600_p2, %p49_p1  ;;  %p1675_p5 = scmp.eq.s32.totalorder %s1144_s18, 0 }
  0x12   : > { %s37_s25 = ssub.s32 %s1577_s16, %s1664_s22  ;;  %s66_s26 = sadd.s32 1, %s1664_s22 }
  0x13   : > { %p40_p6 = scmp.eq.s32.totalorder %s37_s25, 0  ;;  %p1687_p7 = por %p1675_p5, %p55_p3 }
  0x14   : > { %s1691_s28 = ssub.s32 %s33_s20, %s66_s26  ;;  %p111_p8 = scmp.eq.s32.totalorder %s1144_s18, 1 }
  0x15   : > { %s2615_s27 = scalar_select %p1687_p7, 1, 0 }
  0x16   : > { %s1694_s29 = scalar_select %p40_p6, %s1569_s14, %s42_s21  }
  0x17   : > { %p1700_p10 = por %p111_p8, %p49_p1  ;;  %p117_p11 = scmp.eq.s32.totalorder %s1145_s19, 1 }
  0x18   : > { %p2599_p13 = scmp.lt.s32.totalorder %s1581_s17, 2  ;;  %s137_s3 = sand.u32 1, %s1569_s14  }
  0x19   : > { %s2616_s30 = scalar_select %p1700_p10, 1, 0 }
  0x1a   : > { %p1710_p0 = por %p117_p11, %p55_p3  ;;  %s1148_s5 = sshll.u32 %s137_s3, 6 }
  0x1b   : > { %s1179_s6 = sshll.u32 %s1577_s16, 10  ;;  %s2618_s0 = sld [smem:[#allocation22_spill]] }
  0x1c   : > { %s2617_s4 = scalar_select %p1710_p0, 1, 0 }
  0x1d   : > { %s141_s19 = scalar_lea.vmem [#allocation2], %s1148_s5  ;;  %p1726_p1 = pnand %p2599_p13, %p1671_p4 }
  0x1e   : > { %s149_s20 = sshll.u32 %s141_s19, 4  ;;  %s1732_s25 = scalar_lea.sflag [#allocation3], %s137_s3  ;;  %s1730_s20 = int_to_ptr.vmem [resolvable:$true] %s149_s20 }
  0x1f   : > { %p1412_p6 = pneg %p1726_p1 }
  0x21   : > { %s1720_s18 = scalar_lea.hbm %s2618_s0, %s1179_s6  ;;  %s1415_s7 = scalar_lea.hbm %s2618_s0, 3072 }
  0x22   : > { %s1410_s26 = scalar_lea.hbm %s1720_s18, 1024  ;;  %p1416_p4 = scmp.lt.u32.totalorder %s1720_s18, %s2618_s0 }
  0x23   : > { %p1411_p3 = scmp.ne.s32.totalorder %s1720_s18, %s1410_s26  ;;  %p1417_p12 = scmp.lt.u32.totalorder %s1415_s7, %s1410_s26 }
  0x24   : > { %p1419_p2 = scmp.lt.u32.totalorder %s1410_s26, %s1720_s18 }
  0x25   : > { %p1413_p8 = pnand %p1412_p6, %p1411_p3  ;;  %p1418_p13 = por %p1417_p12, %p1416_p4 }
  0x27   : > { %p1414_p11 = pneg %p1413_p8  ;;  %p1420_p9 = por %p1419_p2, %p1418_p13 }
  0x29   : > { %p1421_p0 = pnand %p1420_p9, %p1414_p11 }
  0x2b   : > { %1424 = shalt.err (!%p1421_p0)
}
  0x2c   : > { %s1425_s3 = scalar_lea.vmem %s1730_s20, 1024  ;;  %s1583_s23 = smov [#allocation2]  }
  0x2d   : > { %p1426_p3 = scmp.ne.s32.totalorder %s1730_s20, %s1425_s3  ;;  %s1430_s5 = sshll.u32 %s1583_s23, 4  ;;  %s1431_s5 = int_to_ptr.vmem [resolvable:$false] %s1430_s5 }
  0x2e   : > { %s1432_s8 = scalar_lea.vmem %s1431_s5, 2048  ;;  %p1433_p7 = scmp.lt.s32.totalorder %s1730_s20, %s1431_s5 }
  0x2f   : > { %p1428_p8 = pnand %p1426_p3, %p1412_p6  ;;  %p1434_p12 = scmp.lt.s32.totalorder %s1432_s8, %s1425_s3 }
  0x31   : > { %p1429_p10 = pneg %p1428_p8  ;;  %p1435_p4 = por %p1434_p12, %p1433_p7 }
  0x33   : > { %p1436_p2 = pnand %p1435_p4, %p1429_p10 }
  0x35   : > { %1439 = shalt.err (!%p1436_p2)
}
  0x36   : > { %s2603_s26 = smov 128   ;;  %s1585_s7 = smov 8  }
  0x37   : > { %1191 = dma.hbm_to_vmem [thread:$0]  (!%p1726_p1), %s1720_s18, 1024, %s1730_s20, %s1732_s25, %s2603_s26, %s2603_s26, %s1585_s7  }
  0x38   : > { %p1154_p7 = scmp.ge.s32.totalorder %s1581_s17, 1  ;;  %p180_p9 = scmp.lt.s32.totalorder %s1581_s17, 3 }
  0x39   : > { %s72_s3 = sadd.s32 1, %s1557_s11  ;;  %p2621_p13 = scmp.eq.s32.totalorder %s1691_s28, 0 }
  0x3a   : > { %p1765_p10 = pnand %p1154_p7, %p180_p9  ;;  %p79_p0 = scmp.ne.s32.totalorder %s1557_s11, %s1553_s10 }
  0x3b   : > { %s1773_s23 = scalar_select %p2621_p13, %s1557_s11, %s72_s3  }
  0x3c   : > { %p85_p6 = scmp.ne.s32.totalorder %s1553_s10, %s1549_s9  ;;  %s159_s5 = sand.u32 1, %s1557_s11  }
  0x3d   : > { %s1076_s0 = scalar_lea.hbm %s2597_s1, %s1179_s6  ;;  %p2622_p1 = scmp.eq.s32.totalorder %s1581_s17, 0 }
  0x3e   : > { %p1789_p3 = por %p85_p6, %p1675_p5  ;;  %s1151_s20 = sshll.u32 %s159_s5, 6 }
  0x3f   : > { %p81_p11 = por %p79_p0, %p2622_p1  ;;  %s1793_s25 = scalar_lea.hbm %s1076_s0, 1024 }
  0x40   : > { %s2623_s18 = scalar_select %p1789_p3, 1, 0 }
  0x41   : > { %s163_s9 = scalar_lea.vmem [#allocation5], %s1151_s20  ;;  %p2624_p8 = scmp.lt.s32.totalorder %s1581_s17, 2 }
  0x42   : > { %s172_s28 = sshll.u32 %s163_s9, 4  ;;  %s1803_s24 = scalar_lea.sflag [#allocation6], %s159_s5  ;;  %s1801_s28 = int_to_ptr.vmem [resolvable:$true] %s172_s28 }
  0x43   : > { %p1797_p12 = pnand %p2624_p8, %p81_p11  ;;  %s1470_s6 = scalar_lea.hbm %s1076_s0, 2048 }
  0x44   : > { %p1441_p5 = scmp.ne.s32.totalorder %s1793_s25, %s1470_s6  ;;  %s1445_s20 = scalar_lea.hbm %s2597_s1, 3072 }
  0x45   : > { %p1442_p4 = pneg %p1797_p12  ;;  %p1446_p9 = scmp.lt.u32.totalorder %s1793_s25, %s2597_s1 }
  0x46   : > { %p1447_p13 = scmp.lt.u32.totalorder %s1445_s20, %s1470_s6  ;;  %p1449_p6 = scmp.lt.u32.totalorder %s1470_s6, %s1793_s25 }
  0x47   : > { %p1443_p2 = pnand %p1442_p4, %p1441_p5 }
  0x48   : > { %p1448_p0 = por %p1447_p13, %p1446_p9 }
  0x49   : > { %p1444_p7 = pneg %p1443_p2 }
  0x4a   : > { %p1450_p1 = por %p1449_p6, %p1448_p0 }
  0x4c   : > { %p1451_p11 = pnand %p1450_p1, %p1444_p7 }
  0x4e   : > { %1454 = shalt.err (!%p1451_p11)
}
  0x4f   : > { %s1455_s0 = scalar_lea.vmem %s1801_s28, 1024  ;;  %s1586_s5 = smov [#allocation5]  }
  0x50   : > { %p1456_p8 = scmp.ne.s32.totalorder %s1801_s28, %s1455_s0  ;;  %s1460_s21 = sshll.u32 %s1586_s5, 4  ;;  %s1461_s21 = int_to_ptr.vmem [resolvable:$false] %s1460_s21 }
  0x51   : > { %s1462_s26 = scalar_lea.vmem %s1461_s21, 2048  ;;  %p1463_p3 = scmp.lt.s32.totalorder %s1801_s28, %s1461_s21 }
  0x52   : > { %p1458_p5 = pnand %p1456_p8, %p1442_p4  ;;  %p1464_p9 = scmp.lt.s32.totalorder %s1462_s26, %s1455_s0 }
  0x54   : > { %p1459_p2 = pneg %p1458_p5  ;;  %p1465_p13 = por %p1464_p9, %p1463_p3 }
  0x56   : > { %p1466_p0 = pnand %p1465_p13, %p1459_p2 }
  0x58   : > { %1469 = shalt.err (!%p1466_p0)
}
  0x59   : > { %s2626_s6 = smov 128   ;;  %184 = sbr.rel (%p1765_p10) target bundleno = 561 (0x231), region = 28 }
  0x5a   : > { %1194 = dma.hbm_to_vmem [thread:$0]  (!%p1797_p12), %s1793_s25, 1024, %s1801_s28, %s1803_s24, %s2626_s6, %s2626_s6, %s1585_s7  }
  0x60   : > { %s1836_s8 = sand.u32 1, %s1565_s13   ;;  %p2627_p3 = scmp.ne.s32.totalorder %s2615_s27, 0 }
  0x61   : > { %s1155_s20 = sshll.u32 %s1836_s8, 6  ;;  %s187_s9 = scalar_lea.sflag [#allocation3], %s1836_s8 }
  0x62   : > { %s190_s3 = scalar_lea.vmem [#allocation2], %s1155_s20 }
  0x63   : > { %1536 = dma.done.wait (%p2627_p3), %s187_s9, 1024  }
  0x64   : > { %1538 = vsyncadd (%p2627_p3), %s187_s9, 4294966272  ;;  %s195_s7 = sand.u32 1, %s1553_s10   ;;  %p2628_p10 = scmp.ne.s32.totalorder %s2623_s18, 0 }
  0x65   : > { %s1156_s19 = sshll.u32 %s195_s7, 6  ;;  %s196_s25 = scalar_lea.sflag [#allocation6], %s195_s7 }
  0x66   : > { %s1847_s28 = scalar_lea.vmem [#allocation5], %s1156_s19 }
  0x67   : > { %1540 = dma.done.wait (%p2628_p10), %s196_s25, 1024  }
  0x68   : > { %1542 = vsyncadd (%p2628_p10), %s196_s25, 4294966272  ;;  %v1853_v0 = vld [vmem:[%s190_s3 + $0x10] sm:$0xff]  ;;  %v1855_v1 = vld [vmem:[%s190_s3] sm:$0xff]  ;;  %s1587_s24 = smov 127   ;;  %v1588_v16 = vmov 0.0   ;;  %s1589_s27 = smov 120  }
  0x69   : > { %313 = vrot.lane.b32.xlu1 %v1853_v0, %s1587_s24  ;;  %309 = vrot.lane.b32.xlu0 %v1855_v1, %s1587_s24  ;;  %v1861_v2 = vld [vmem:[%s190_s3 + $0x18] sm:$0xff]  ;;  %v1863_v3 = vld [vmem:[%s190_s3 + $0x8] sm:$0xff]  ;;  %vm245_vm0 = vcmp.gt.f32.partialorder %v1855_v1, 0.0  ;;  %vm247_vm2 = vcmp.gt.f32.partialorder %v1853_v0, 0.0  ;;  %s1590_s18 = smov 126   ;;  %s1591_s0 = smov 124  }
  0x6a   : > { %v1869_v4 = vld [vmem:[%s190_s3 + $0x28] sm:$0xff]  ;;  %v1871_v5 = vld [vmem:[%s190_s3 + $0x20] sm:$0xff]  ;;  %v1877_v6 = vld [vmem:[%s190_s3 + $0x38] sm:$0xff]  ;;  %vm246_vm1 = vcmp.gt.f32.partialorder %v1863_v3, 0.0  ;;  %vm248_vm3 = vcmp.gt.f32.partialorder %v1861_v2, 0.0  ;;  %v1925_v17 = vsel %vm245_vm0, 1.0, %v1588_v16 }
  0x6b   : > { %v1879_v7 = vld [vmem:[%s190_s3 + $0x30] sm:$0xff]  ;;  %v1886_v8 = vld [vmem:[%s1847_s28 + $0x8] sm:$0xff]  ;;  %v1889_v9 = vld [vmem:[%s1847_s28] sm:$0xff]  ;;  %v1927_v18 = vsel %vm246_vm1, 1.0, %v1588_v16  ;;  %v1929_v19 = vsel %vm247_vm2, 1.0, %v1588_v16  ;;  %v1931_v20 = vsel %vm248_vm3, 1.0, %v1588_v16 }
  0x6c   : > { %v1896_v10 = vld [vmem:[%s1847_s28 + $0x18] sm:$0xff]  ;;  %v1899_v11 = vld [vmem:[%s1847_s28 + $0x10] sm:$0xff]  ;;  %v1906_v12 = vld [vmem:[%s1847_s28 + $0x28] sm:$0xff]  ;;  %vm249_vm4 = vcmp.gt.f32.partialorder %v1871_v5, 0.0  ;;  %vm250_vm5 = vcmp.gt.f32.partialorder %v1869_v4, 0.0  ;;  %vm251_vm6 = vcmp.gt.f32.partialorder %v1879_v7, 0.0  ;;  %v1282_v21 = vpack.i.bf16 %v1927_v18, %v1925_v17 }
  0x6d   : > { %315 = vrot.lane.b32.xlu1 %v1861_v2, %s1587_s24  ;;  %311 = vrot.lane.b32.xlu0 %v1863_v3, %s1587_s24  ;;  %v1909_v13 = vld [vmem:[%s1847_s28 + $0x20] sm:$0xff]  ;;  %v1920_v14 = vld [vmem:[%s1847_s28 + $0x38] sm:$0xff]  ;;  %vm252_vm7 = vcmp.gt.f32.partialorder %v1877_v6, 0.0  ;;  %v1287_v22 = vpack.i.bf16 %v1931_v20, %v1929_v19  ;;  %v1945_v23 = vsel %vm249_vm4, 1.0, %v1588_v16  ;;  %v1947_v24 = vsel %vm250_vm5, 1.0, %v1588_v16  ;;  %s2511_s5 = scalar_lea.vmem [#allocation7], %s1155_s20 }
  0x6e   : > { %v1923_v15 = vld [vmem:[%s1847_s28 + $0x30] sm:$0xff]  ;;  %v1949_v25 = vsel %vm251_vm6, 1.0, %v1588_v16  ;;  %v1951_v26 = vsel %vm252_vm7, 1.0, %v1588_v16  ;;  %vm253_vm8 = vcmp.gt.f32.partialorder %v1889_v9, 0.0  ;;  %vm254_vm9 = vcmp.gt.f32.partialorder %v1886_v8, 0.0  ;;  %s1181_s21 = sshll.u32 %s1573_s15, 10 }
  0x6f   : > { %vm255_vm10 = vcmp.gt.f32.partialorder %v1899_v11, 0.0  ;;  %vm256_vm11 = vcmp.gt.f32.partialorder %v1896_v10, 0.0  ;;  %v1961_v27 = vpack.i.bf16 %v1947_v24, %v1945_v23  ;;  %v1965_v28 = vpack.i.bf16 %v1951_v26, %v1949_v25  ;;  %s1033_s26 = sshll.u32 %s2511_s5, 4  ;;  %s2532_s9 = scalar_lea.hbm %s2598_s2, %s1181_s21  ;;  %s2534_s26 = int_to_ptr.vmem [resolvable:$true] %s1033_s26 }
  0x70   : > { %v1967_v29 = vsel %vm253_vm8, 1.0, %v1588_v16  ;;  %v1969_v30 = vsel %vm254_vm9, 1.0, %v1588_v16  ;;  %v1971_v31 = vsel %vm255_vm10, 1.0, %v1588_v16  ;;  %v1973_v32 = vsel %vm256_vm11, 1.0, %v1588_v16  ;;  %s1019_s15 = scalar_lea.sflag [#allocation4], %s1836_s8  ;;  %s1471_s3 = scalar_lea.vmem %s2534_s26, 1024 }
  0x71   : > { %319 = vrot.lane.b32.xlu1 %v1869_v4, %s1587_s24  ;;  %317 = vrot.lane.b32.xlu0 %v1871_v5, %s1587_s24  ;;  %vm257_vm12 = vcmp.gt.f32.partialorder %v1909_v13, 0.0  ;;  %vm258_vm13 = vcmp.gt.f32.partialorder %v1906_v12, 0.0  ;;  %vm259_vm14 = vcmp.gt.f32.partialorder %v1923_v15, 0.0  ;;  %vm260_vm15 = vcmp.gt.f32.partialorder %v1920_v14, 0.0  ;;  %p1472_p12 = scmp.ne.s32.totalorder %s2534_s26, %s1471_s3  ;;  %p2651_p4 = scmp.ne.s32.totalorder %s2616_s30, 0 }
  0x72   : > { %v1985_v33 = vpack.i.bf16 %v1969_v30, %v1967_v29  ;;  %v1989_v34 = vpack.i.bf16 %v1973_v32, %v1971_v31  ;;  %v1991_v35 = vsel %vm257_vm12, 1.0, %v1588_v16  ;;  %v1993_v36 = vsel %vm258_vm13, 1.0, %v1588_v16  ;;  %s1592_s7 = smov [#allocation7]  }
  0x73   : > { %v1995_v37 = vsel %vm259_vm14, 1.0, %v1588_v16  ;;  %v1997_v38 = vsel %vm260_vm15, 1.0, %v1588_v16  ;;  %v2005_v39 = vpack.i.bf16 %v1993_v36, %v1991_v35  ;;  %vm1009_vm0 = vcmask 130048   ;;  %p1473_p7 = pnand %p1472_p12, %p2651_p4  ;;  %s1475_s19 = sshll.u32 %s1592_s7, 4  ;;  %s1476_s19 = int_to_ptr.vmem [resolvable:$false] %s1475_s19 }
  0x74   : > { %v2009_v40 = vpack.i.bf16 %v1997_v38, %v1995_v37  ;;  %s1477_s25 = scalar_lea.vmem %s1476_s19, 2048  ;;  %p1478_p1 = scmp.lt.s32.totalorder %s2534_s26, %s1476_s19 }
  0x75   : > { %323 = vrot.lane.b32.xlu1 %v1877_v6, %s1587_s24  ;;  %321 = vrot.lane.b32.xlu0 %v1879_v7, %s1587_s24  ;;  %p1474_p6 = pneg %p1473_p7  ;;  %p1479_p11 = scmp.lt.s32.totalorder %s1477_s25, %s1471_s3 }
  0x77   : > { %p1480_p8 = por %p1479_p11, %p1478_p1 }
  0x79   : > { %327 = vrot.lane.b32.xlu1 %v1886_v8, %s1587_s24  ;;  %325 = vrot.lane.b32.xlu0 %v1889_v9, %s1587_s24  ;;  %p1481_p5 = pnand %p1480_p8, %p1474_p6 }
  0x7d   : > { %331 = vrot.lane.b32.xlu1 %v1896_v10, %s1587_s24  ;;  %329 = vrot.lane.b32.xlu0 %v1899_v11, %s1587_s24 }
  0x81   : > { %335 = vrot.lane.b32.xlu1 %v1906_v12, %s1587_s24  ;;  %333 = vrot.lane.b32.xlu0 %v1909_v13, %s1587_s24 }
  0x85   : > { %339 = vrot.lane.b32.xlu1 %v1920_v14, %s1587_s24  ;;  %337 = vrot.lane.b32.xlu0 %v1923_v15, %s1587_s24 }
  0x89   : > { %1283 = vrot.lane.b32.xlu1 %v1282_v21, %s1587_s24  ;;  %1288 = vrot.lane.b32.xlu0 %v1287_v22, %s1587_s24 }
  0x8d   : > { %1293 = vrot.lane.b32.xlu1 %v1961_v27, %s1587_s24  ;;  %1298 = vrot.lane.b32.xlu0 %v1965_v28, %s1587_s24 }
  0x91   : > { %1303 = vrot.lane.b32.xlu1 %v1985_v33, %s1587_s24  ;;  %1308 = vrot.lane.b32.xlu0 %v1989_v34, %s1587_s24 }
  0x95   : > { %1313 = vrot.lane.b32.xlu1 %v2005_v39, %s1587_s24  ;;  %1318 = vrot.lane.b32.xlu0 %v2009_v40, %s1587_s24 }
  0x99   : > { %533 = vrot.lane.b32.xlu0 %v1855_v1, %s1589_s27  ;;  %535 = vrot.lane.b32.xlu1 %v1863_v3, %s1589_s27 }
  0x9d   : > { %537 = vrot.lane.b32.xlu0 %v1853_v0, %s1589_s27  ;;  %539 = vrot.lane.b32.xlu1 %v1861_v2, %s1589_s27 }
  0xa1   : > { %541 = vrot.lane.b32.xlu0 %v1871_v5, %s1589_s27  ;;  %1328 = vrot.lane.b32.xlu1 %v1287_v22, %s1589_s27 }
  0xa5   : > { %1323 = vrot.lane.b32.xlu0 %v1282_v21, %s1589_s27 }
  0xdb   : > { %v314_v41 = vpop.permute.xlu1 %313  ;;  %v310_v42 = vpop.permute.xlu0 %309 }
  0xdc   : > { %v2028_v43 = vadd.f32 %v310_v42, %v1855_v1  ;;  %v2033_v46 = vadd.f32 %v314_v41, %v1853_v0 }
  0xde   : > { %389 = vrot.lane.b32.xlu0 %v2028_v43, %s1590_s18 }
  0xdf   : > { %v316_v44 = vpop.permute.xlu1 %315  ;;  %v312_v45 = vpop.permute.xlu0 %311 }
  0xe0   : > { %v2036_v47 = vadd.f32 %v312_v45, %v1863_v3  ;;  %v2043_v50 = vadd.f32 %v316_v44, %v1861_v2 }
  0xe2   : > { %393 = vrot.lane.b32.xlu0 %v2033_v46, %s1590_s18  ;;  %391 = vrot.lane.b32.xlu1 %v2036_v47, %s1590_s18 }
  0xe3   : > { %v320_v48 = vpop.permute.xlu1 %319  ;;  %v318_v49 = vpop.permute.xlu0 %317 }
  0xe4   : > { %v2046_v51 = vadd.f32 %v318_v49, %v1871_v5  ;;  %v2053_v54 = vadd.f32 %v320_v48, %v1869_v4 }
  0xe6   : > { %397 = vrot.lane.b32.xlu0 %v2046_v51, %s1590_s18  ;;  %395 = vrot.lane.b32.xlu1 %v2043_v50, %s1590_s18 }
  0xe7   : > { %v324_v52 = vpop.permute.xlu1 %323  ;;  %v322_v53 = vpop.permute.xlu0 %321 }
  0xe8   : > { %v2056_v55 = vadd.f32 %v322_v53, %v1879_v7  ;;  %v2063_v58 = vadd.f32 %v324_v52, %v1877_v6 }
  0xea   : > { %401 = vrot.lane.b32.xlu0 %v2056_v55, %s1590_s18  ;;  %399 = vrot.lane.b32.xlu1 %v2053_v54, %s1590_s18 }
  0xeb   : > { %v328_v56 = vpop.permute.xlu1 %327  ;;  %v326_v57 = vpop.permute.xlu0 %325 }
  0xec   : > { %v2066_v59 = vadd.f32 %v326_v57, %v1889_v9  ;;  %v2073_v62 = vadd.f32 %v328_v56, %v1886_v8 }
  0xee   : > { %405 = vrot.lane.b32.xlu0 %v2066_v59, %s1590_s18  ;;  %403 = vrot.lane.b32.xlu1 %v2063_v58, %s1590_s18 }
  0xef   : > { %v332_v60 = vpop.permute.xlu1 %331  ;;  %v330_v61 = vpop.permute.xlu0 %329 }
  0xf0   : > { %v2076_v63 = vadd.f32 %v330_v61, %v1899_v11  ;;  %v2083_v2 = vadd.f32 %v332_v60, %v1896_v10 }
  0xf2   : > { %409 = vrot.lane.b32.xlu0 %v2076_v63, %s1590_s18  ;;  %407 = vrot.lane.b32.xlu1 %v2073_v62, %s1590_s18 }
  0xf3   : > { %v336_v0 = vpop.permute.xlu1 %335  ;;  %v334_v1 = vpop.permute.xlu0 %333 }
  0xf4   : > { %v2086_v3 = vadd.f32 %v334_v1, %v1909_v13  ;;  %v2093_v21 = vadd.f32 %v336_v0, %v1906_v12 }
  0xf6   : > { %413 = vrot.lane.b32.xlu0 %v2086_v3, %s1590_s18  ;;  %411 = vrot.lane.b32.xlu1 %v2083_v2, %s1590_s18 }
  0xf7   : > { %v340_v5 = vpop.permute.xlu1 %339  ;;  %v338_v16 = vpop.permute.xlu0 %337 }
  0xf8   : > { %v2096_v22 = vadd.f32 %v338_v16, %v1923_v15  ;;  %v2103_v44 = vadd.f32 %v340_v5, %v1920_v14 }
  0xfa   : > { %417 = vrot.lane.b32.xlu0 %v2096_v22, %s1590_s18  ;;  %415 = vrot.lane.b32.xlu1 %v2093_v21, %s1590_s18 }
  0xfb   : > { %v1284_v41 = vpop.permute.xlu1 %1283  ;;  %v1289_v42 = vpop.permute.xlu0 %1288 }
  0xfc   : > { %v2106_v45 = vadd.high.f32.bf16 %v1927_v18, %v1284_v41  ;;  %v2109_v48 = vadd.low.f32.bf16 %v1925_v17, %v1284_v41  ;;  %v2114_v52 = vadd.high.f32.bf16 %v1931_v20, %v1289_v42  ;;  %v2119_v56 = vadd.low.f32.bf16 %v1929_v19, %v1289_v42 }
  0xfe   : > { %419 = vrot.lane.b32.xlu1 %v2103_v44, %s1590_s18  ;;  %737 = vrot.lane.b32.xlu0 %v2106_v45, %s1590_s18 }
  0xff   : > { %v1294_v49 = vpop.permute.xlu1 %1293  ;;  %v1299_v53 = vpop.permute.xlu0 %1298 }
 0x100   : > { %v2124_v17 = vadd.high.f32.bf16 %v1947_v24, %v1294_v49  ;;  %v2129_v20 = vadd.low.f32.bf16 %v1945_v23, %v1294_v49  ;;  %v2134_v57 = vadd.high.f32.bf16 %v1951_v26, %v1299_v53  ;;  %v2139_v24 = vadd.low.f32.bf16 %v1949_v25, %v1299_v53 }
 0x102   : > { %735 = vrot.lane.b32.xlu1 %v2109_v48, %s1590_s18  ;;  %741 = vrot.lane.b32.xlu0 %v2114_v52, %s1590_s18 }
 0x103   : > { %v1304_v18 = vpop.permute.xlu1 %1303  ;;  %v1309_v19 = vpop.permute.xlu0 %1308 }
 0x104   : > { %v2144_v60 = vadd.high.f32.bf16 %v1969_v30, %v1304_v18  ;;  %v2149_v26 = vadd.low.f32.bf16 %v1967_v29, %v1304_v18  ;;  %v2154_v61 = vadd.high.f32.bf16 %v1973_v32, %v1309_v19  ;;  %v2159_v30 = vadd.low.f32.bf16 %v1971_v31, %v1309_v19 }
 0x106   : > { %739 = vrot.lane.b32.xlu1 %v2119_v56, %s1590_s18  ;;  %745 = vrot.lane.b32.xlu0 %v2124_v17, %s1590_s18 }
 0x107   : > { %v1314_v23 = vpop.permute.xlu1 %1313  ;;  %v1319_v25 = vpop.permute.xlu0 %1318 }
 0x108   : > { %v2164_v0 = vadd.high.f32.bf16 %v1993_v36, %v1314_v23  ;;  %v2169_v29 = vadd.low.f32.bf16 %v1991_v35, %v1314_v23  ;;  %v2174_v32 = vadd.high.f32.bf16 %v1997_v38, %v1319_v25  ;;  %v2179_v31 = vadd.low.f32.bf16 %v1995_v37, %v1319_v25 }
 0x10a   : > { %743 = vrot.lane.b32.xlu1 %v2129_v20, %s1590_s18  ;;  %749 = vrot.lane.b32.xlu0 %v2134_v57, %s1590_s18 }
 0x10e   : > { %747 = vrot.lane.b32.xlu1 %v2139_v24, %s1590_s18  ;;  %753 = vrot.lane.b32.xlu0 %v2144_v60, %s1590_s18 }
 0x112   : > { %751 = vrot.lane.b32.xlu1 %v2149_v26, %s1590_s18  ;;  %757 = vrot.lane.b32.xlu0 %v2154_v61, %s1590_s18 }
 0x116   : > { %755 = vrot.lane.b32.xlu1 %v2159_v30, %s1590_s18  ;;  %761 = vrot.lane.b32.xlu0 %v2164_v0, %s1590_s18 }
 0x11a   : > { %759 = vrot.lane.b32.xlu1 %v2169_v29, %s1590_s18  ;;  %765 = vrot.lane.b32.xlu0 %v2174_v32, %s1590_s18 }
 0x11e   : > { %763 = vrot.lane.b32.xlu1 %v2179_v31, %s1590_s18  ;;  %1333 = vrot.lane.b32.xlu0 %v1961_v27, %s1589_s27  ;;  %v2203_v27 = vpop.permute.xlu0 %533 }
 0x122   : > { %1338 = vrot.lane.b32.xlu1 %v1965_v28, %s1589_s27  ;;  %1343 = vrot.lane.b32.xlu0 %v1985_v33, %s1589_s27  ;;  %v2205_v28 = vpop.permute.xlu0 %537  ;;  %v2207_v33 = vpop.permute.xlu1 %535 }
 0x126   : > { %1348 = vrot.lane.b32.xlu1 %v1989_v34, %s1589_s27  ;;  %1353 = vrot.lane.b32.xlu0 %v2005_v39, %s1589_s27  ;;  %v2209_v35 = vpop.permute.xlu0 %541  ;;  %v2211_v34 = vpop.permute.xlu1 %539 }
 0x12a   : > { %1358 = vrot.lane.b32.xlu1 %v2009_v40, %s1589_s27  ;;  %545 = vrot.lane.b32.xlu0 %v1879_v7, %s1589_s27  ;;  %v2213_v36 = vpop.permute.xlu0 %1323  ;;  %v2215_v37 = vpop.permute.xlu1 %1328 }
 0x12e   : > { %543 = vrot.lane.b32.xlu1 %v1869_v4, %s1589_s27 }
 0x150   : > { %v390_v38 = vpop.permute.xlu0 %389 }
 0x151   : > { %v2218_v7 = vadd.f32 %v390_v38, %v2028_v43 }
 0x153   : > { %469 = vrot.lane.b32.xlu0 %v2218_v7, %s1591_s0 }
 0x154   : > { %v394_v4 = vpop.permute.xlu0 %393  ;;  %v392_v39 = vpop.permute.xlu1 %391 }
 0x155   : > { %v2223_v40 = vadd.f32 %v394_v4, %v2033_v46  ;;  %v2226_v1 = vadd.f32 %v392_v39, %v2036_v47 }
 0x157   : > { %473 = vrot.lane.b32.xlu0 %v2223_v40, %s1591_s0  ;;  %471 = vrot.lane.b32.xlu1 %v2226_v1, %s1591_s0 }
 0x158   : > { %v398_v43 = vpop.permute.xlu0 %397  ;;  %v396_v5 = vpop.permute.xlu1 %395 }
 0x159   : > { %v2233_v16 = vadd.f32 %v398_v43, %v2046_v51  ;;  %v2236_v41 = vadd.f32 %v396_v5, %v2043_v50 }
 0x15b   : > { %477 = vrot.lane.b32.xlu0 %v2233_v16, %s1591_s0  ;;  %475 = vrot.lane.b32.xlu1 %v2236_v41, %s1591_s0 }
 0x15c   : > { %v402_v46 = vpop.permute.xlu0 %401  ;;  %v400_v47 = vpop.permute.xlu1 %399 }
 0x15d   : > { %v2243_v42 = vadd.f32 %v402_v46, %v2056_v55  ;;  %v2246_v49 = vadd.f32 %v400_v47, %v2053_v54 }
 0x15f   : > { %481 = vrot.lane.b32.xlu0 %v2243_v42, %s1591_s0  ;;  %479 = vrot.lane.b32.xlu1 %v2246_v49, %s1591_s0 }
 0x160   : > { %v406_v50 = vpop.permute.xlu0 %405  ;;  %v404_v51 = vpop.permute.xlu1 %403 }
 0x161   : > { %v2253_v53 = vadd.f32 %v406_v50, %v2066_v59  ;;  %v2256_v18 = vadd.f32 %v404_v51, %v2063_v58 }
 0x163   : > { %485 = vrot.lane.b32.xlu0 %v2253_v53, %s1591_s0  ;;  %483 = vrot.lane.b32.xlu1 %v2256_v18, %s1591_s0 }
 0x164   : > { %v410_v54 = vpop.permute.xlu0 %409  ;;  %v408_v55 = vpop.permute.xlu1 %407 }
 0x165   : > { %v2263_v19 = vadd.f32 %v410_v54, %v2076_v63  ;;  %v2266_v23 = vadd.f32 %v408_v55, %v2073_v62 }
 0x167   : > { %489 = vrot.lane.b32.xlu0 %v2263_v19, %s1591_s0  ;;  %487 = vrot.lane.b32.xlu1 %v2266_v23, %s1591_s0 }
 0x168   : > { %v414_v58 = vpop.permute.xlu0 %413  ;;  %v412_v59 = vpop.permute.xlu1 %411 }
 0x169   : > { %v2273_v25 = vadd.f32 %v414_v58, %v2086_v3  ;;  %v2276_v38 = vadd.f32 %v412_v59, %v2083_v2 }
 0x16b   : > { %2629 = vst [vmem:[#allocation11_spill] sm:$0xff] %v2276_v38  ;;  %493 = vrot.lane.b32.xlu0 %v2273_v25, %s1591_s0  ;;  %491 = vrot.lane.b32.xlu1 %v2276_v38, %s1591_s0 }
 0x16c   : > { %v418_v62 = vpop.permute.xlu0 %417  ;;  %v416_v63 = vpop.permute.xlu1 %415 }
 0x16d   : > { %v2283_v4 = vadd.f32 %v418_v62, %v2096_v22  ;;  %v2286_v39 = vadd.f32 %v416_v63, %v2093_v21 }
 0x16f   : > { %2630 = vst [vmem:[#allocation12_spill] sm:$0xff] %v2283_v4  ;;  %2631 = vst [vmem:[#allocation13_spill] sm:$0xff] %v2286_v39  ;;  %497 = vrot.lane.b32.xlu0 %v2283_v4, %s1591_s0  ;;  %495 = vrot.lane.b32.xlu1 %v2286_v39, %s1591_s0 }
 0x170   : > { %v420_v2 = vpop.permute.xlu1 %419  ;;  %v738_v43 = vpop.permute.xlu0 %737 }
 0x171   : > { %v2293_v3 = vadd.f32 %v420_v2, %v2103_v44  ;;  %v2296_v5 = vadd.f32 %v2106_v45, %v738_v43 }
 0x173   : > { %2632 = vst [vmem:[#allocation14_spill] sm:$0xff] %v2293_v3  ;;  %499 = vrot.lane.b32.xlu1 %v2293_v3, %s1591_s0  ;;  %817 = vrot.lane.b32.xlu0 %v2296_v5, %s1591_s0 }
 0x174   : > { %v736_v22 = vpop.permute.xlu1 %735  ;;  %v742_v46 = vpop.permute.xlu0 %741 }
 0x175   : > { %v2301_v21 = vadd.f32 %v2109_v48, %v736_v22  ;;  %v2306_v47 = vadd.f32 %v2114_v52, %v742_v46 }
 0x177   : > { %815 = vrot.lane.b32.xlu1 %v2301_v21, %s1591_s0  ;;  %821 = vrot.lane.b32.xlu0 %v2306_v47, %s1591_s0 }
 0x178   : > { %v740_v44 = vpop.permute.xlu1 %739  ;;  %v746_v50 = vpop.permute.xlu0 %745 }
 0x179   : > { %v2311_v45 = vadd.f32 %v2119_v56, %v740_v44  ;;  %v2316_v48 = vadd.f32 %v2124_v17, %v746_v50 }
 0x17b   : > { %819 = vrot.lane.b32.xlu1 %v2311_v45, %s1591_s0  ;;  %825 = vrot.lane.b32.xlu0 %v2316_v48, %s1591_s0 }
 0x17c   : > { %v744_v51 = vpop.permute.xlu1 %743  ;;  %v750_v54 = vpop.permute.xlu0 %749 }
 0x17d   : > { %v2321_v52 = vadd.f32 %v2129_v20, %v744_v51  ;;  %v2326_v56 = vadd.f32 %v2134_v57, %v750_v54 }
 0x17f   : > { %823 = vrot.lane.b32.xlu1 %v2321_v52, %s1591_s0  ;;  %829 = vrot.lane.b32.xlu0 %v2326_v56, %s1591_s0 }
 0x180   : > { %v748_v55 = vpop.permute.xlu1 %747  ;;  %v754_v58 = vpop.permute.xlu0 %753 }
 0x181   : > { %v2331_v17 = vadd.f32 %v2139_v24, %v748_v55  ;;  %v2336_v20 = vadd.f32 %v2144_v60, %v754_v58 }
 0x183   : > { %827 = vrot.lane.b32.xlu1 %v2331_v17, %s1591_s0  ;;  %833 = vrot.lane.b32.xlu0 %v2336_v20, %s1591_s0 }
 0x184   : > { %v752_v59 = vpop.permute.xlu1 %751  ;;  %v758_v62 = vpop.permute.xlu0 %757 }
 0x185   : > { %v2341_v57 = vadd.f32 %v2149_v26, %v752_v59  ;;  %v2346_v24 = vadd.f32 %v2154_v61, %v758_v62 }
 0x187   : > { %831 = vrot.lane.b32.xlu1 %v2341_v57, %s1591_s0  ;;  %837 = vrot.lane.b32.xlu0 %v2346_v24, %s1591_s0 }
 0x188   : > { %v756_v63 = vpop.permute.xlu1 %755  ;;  %v762_v2 = vpop.permute.xlu0 %761 }
 0x189   : > { %v2351_v60 = vadd.f32 %v2159_v30, %v756_v63  ;;  %v2356_v26 = vadd.f32 %v2164_v0, %v762_v2 }
 0x18b   : > { %835 = vrot.lane.b32.xlu1 %v2351_v60, %s1591_s0  ;;  %841 = vrot.lane.b32.xlu0 %v2356_v26, %s1591_s0 }
 0x18c   : > { %v760_v43 = vpop.permute.xlu1 %759  ;;  %v766_v30 = vpop.permute.xlu0 %765 }
 0x18d   : > { %v2361_v61 = vadd.f32 %v2169_v29, %v760_v43  ;;  %v2373_v0 = vadd.f32 %v2174_v32, %v766_v30 }
 0x18f   : > { %839 = vrot.lane.b32.xlu1 %v2361_v61, %s1591_s0  ;;  %549 = vrot.lane.b32.xlu0 %v1889_v9, %s1589_s27  ;;  %2633 = vst [vmem:[#allocation15_spill] sm:$0xff] %v2373_v0 }
 0x190   : > { %v764_v22 = vpop.permute.xlu1 %763 }
 0x191   : > { %v2368_v46 = vadd.f32 %v2179_v31, %v764_v22 }
 0x193   : > { %843 = vrot.lane.b32.xlu1 %v2368_v46, %s1591_s0  ;;  %845 = vrot.lane.b32.xlu0 %v2373_v0, %s1591_s0 }
 0x194   : > { %v2395_v9 = vpop.permute.xlu1 %1338 }
 0x197   : > { %547 = vrot.lane.b32.xlu1 %v1877_v6, %s1589_s27  ;;  %553 = vrot.lane.b32.xlu0 %v1899_v11, %s1589_s27  ;;  %v1334_v6 = vpop.permute.xlu0 %1333 }
 0x19b   : > { %551 = vrot.lane.b32.xlu1 %v1886_v8, %s1589_s27  ;;  %557 = vrot.lane.b32.xlu0 %v1909_v13, %s1589_s27  ;;  %v2397_v11 = vpop.permute.xlu0 %1343  ;;  %v2399_v8 = vpop.permute.xlu1 %1348 }
 0x19f   : > { %555 = vrot.lane.b32.xlu1 %v1896_v10, %s1589_s27  ;;  %561 = vrot.lane.b32.xlu0 %v1923_v15, %s1589_s27  ;;  %v2401_v13 = vpop.permute.xlu0 %1353  ;;  %v2403_v29 = vpop.permute.xlu1 %1358 }
 0x1a0   : > { %2634 = vst [vmem:[#allocation16_spill] sm:$0xff] %v2403_v29 }
 0x1a3   : > { %559 = vrot.lane.b32.xlu1 %v1906_v12, %s1589_s27  ;;  %v546_v10 = vpop.permute.xlu0 %545  ;;  %v544_v32 = vpop.permute.xlu1 %543 }
 0x1a7   : > { %563 = vrot.lane.b32.xlu1 %v1920_v14, %s1589_s27 }
 0x1c5   : > { %v470_v15 = vpop.permute.xlu0 %469 }
 0x1c9   : > { %v474_v31 = vpop.permute.xlu0 %473  ;;  %v472_v44 = vpop.permute.xlu1 %471 }
 0x1cd   : > { %v478_v12 = vpop.permute.xlu0 %477  ;;  %v476_v50 = vpop.permute.xlu1 %475 }
 0x1d1   : > { %v482_v51 = vpop.permute.xlu0 %481  ;;  %v480_v14 = vpop.permute.xlu1 %479 }
 0x1d2   : > { %v523_v54 = vadd.f32 %v482_v51, %v2243_v42  ;;  %v522_v55 = vadd.f32 %v480_v14, %v2246_v49 }
 0x1d4   : > { %v2407_v58 = vadd.f32 %v546_v10, %v523_v54  ;;  %v2409_v59 = vadd.f32 %v544_v32, %v522_v55 }
 0x1d5   : > { %v2411_v62 = vpop.permute.xlu0 %485  ;;  %v2413_v63 = vpop.permute.xlu1 %483 }
 0x1d6   : > { %2635 = vst [vmem:[#allocation17_spill] sm:$0xff] %v2407_v58  ;;  %v2417_v2 = vadd.f32 %v2407_v58, %v2409_v59 }
 0x1d9   : > { %v2419_v43 = vpop.permute.xlu0 %489  ;;  %v2421_v30 = vpop.permute.xlu1 %487 }
 0x1dd   : > { %v2423_v22 = vpop.permute.xlu0 %493  ;;  %v2425_v42 = vpop.permute.xlu1 %491 }
 0x1de   : > { %2636 = vst [vmem:[#allocation18_spill] sm:$0xff] %v2425_v42 }
 0x1e1   : > { %v2427_v49 = vpop.permute.xlu1 %495  ;;  %v2429_v10 = vpop.permute.xlu0 %497 }
 0x1e2   : > { %2637 = vst [vmem:[#allocation19_spill] sm:$0xff] %v2427_v49  ;;  %2638 = vst [vmem:[#allocation20_spill] sm:$0xff] %v2429_v10 }
 0x1e5   : > { %v2431_v32 = vpop.permute.xlu1 %499  ;;  %v818_v51 = vpop.permute.xlu0 %817 }
 0x1e6   : > { %2639 = vst [vmem:[#allocation21_spill] sm:$0xff] %v2431_v32  ;;  %v864_v3 = vadd.f32 %v818_v51, %v2296_v5  ;;  %v521_v51 = vadd.f32 %v478_v12, %v2233_v16 }
 0x1e8   : > { %v1395_v49 = vadd.high.f32.bf16 %v864_v3, %v2213_v36  ;;  %v585_v16 = vadd.f32 %v2209_v35, %v521_v51 }
 0x1e9   : > { %v816_v14 = vpop.permute.xlu1 %815  ;;  %v822_v55 = vpop.permute.xlu0 %821 }
 0x1ea   : > { %v863_v54 = vadd.f32 %v816_v14, %v2301_v21  ;;  %v866_v39 = vadd.f32 %v822_v55, %v2306_v47 }
 0x1ec   : > { %v1394_v58 = vadd.low.f32.bf16 %v863_v54, %v2213_v36  ;;  %v1396_v10 = vadd.high.f32.bf16 %v866_v39, %v2215_v37  ;;  %v520_v54 = vadd.f32 %v476_v50, %v2236_v41 }
 0x1ed   : > { %v820_v4 = vpop.permute.xlu1 %819  ;;  %v826_v38 = vpop.permute.xlu0 %825 }
 0x1ee   : > { %v865_v42 = vadd.f32 %v820_v4, %v2311_v45  ;;  %v868_v0 = vadd.f32 %v826_v38, %v2316_v48  ;;  %v943_v14 = vadd.f32 %v1395_v49, %v1394_v58  ;;  %v518_v38 = vadd.f32 %v472_v44, %v2226_v1 }
 0x1ef   : > { %v584_v41 = vadd.f32 %v2211_v34, %v520_v54 }
 0x1f0   : > { %v1397_v32 = vadd.low.f32.bf16 %v865_v42, %v2215_v37  ;;  %v1398_v55 = vadd.high.f32.bf16 %v868_v0, %v1334_v6  ;;  %v519_v37 = vadd.f32 %v474_v31, %v2223_v40  ;;  %v582_v44 = vadd.f32 %v2207_v33, %v518_v38 }
 0x1f1   : > { %v824_v21 = vpop.permute.xlu1 %823  ;;  %v830_v4 = vpop.permute.xlu0 %829 }
 0x1f2   : > { %v944_v29 = vadd.f32 %v1397_v32, %v1395_v49  ;;  %v945_v5 = vadd.f32 %v1397_v32, %v1396_v10  ;;  %v867_v47 = vadd.f32 %v824_v21, %v2321_v52  ;;  %v870_v39 = vadd.f32 %v830_v4, %v2326_v56 }
 0x1f3   : > { %v517_v52 = vadd.f32 %v470_v15, %v2218_v7  ;;  %v583_v31 = vadd.f32 %v2205_v28, %v519_v37  ;;  %v600_v49 = vadd.f32 %v585_v16, %v584_v41 }
 0x1f4   : > { %v957_v45 = vadd.f32 %v945_v5, %v943_v14  ;;  %v1399_v36 = vadd.low.f32.bf16 %v867_v47, %v1334_v6  ;;  %v1400_v0 = vadd.high.f32.bf16 %v870_v39, %v2395_v9 }
 0x1f5   : > { %v828_v3 = vpop.permute.xlu1 %827  ;;  %v834_v6 = vpop.permute.xlu0 %833  ;;  %v581_v34 = vadd.f32 %v2203_v27, %v517_v52  ;;  %v599_v15 = vadd.f32 %v584_v41, %v583_v31  ;;  %v598_v14 = vadd.f32 %v583_v31, %v582_v44  ;;  %v2465_v27 = vadd.f32 %v2409_v59, %v585_v16 }
 0x1f6   : > { %v946_v48 = vadd.f32 %v1399_v36, %v1396_v10  ;;  %v947_v58 = vadd.f32 %v1399_v36, %v1398_v55  ;;  %v869_v42 = vadd.f32 %v828_v3, %v2331_v17  ;;  %v872_v1 = vadd.f32 %v834_v6, %v2336_v20 }
 0x1f7   : > { %v597_v21 = vadd.f32 %v582_v44, %v581_v34  ;;  %v524_v59 = vadd.f32 %v2413_v63, %v2256_v18  ;;  %v2482_v41 = vadd.f32 %v2417_v2, %v600_v49 }
 0x1f8   : > { %v958_v12 = vadd.f32 %v946_v48, %v944_v29  ;;  %v959_v56 = vadd.f32 %v947_v58, %v945_v5  ;;  %v1401_v40 = vadd.low.f32.bf16 %v869_v42, %v2395_v9  ;;  %v1402_v9 = vadd.high.f32.bf16 %v872_v1, %v2397_v11 }
 0x1f9   : > { %v832_v17 = vpop.permute.xlu1 %831  ;;  %v838_v10 = vpop.permute.xlu0 %837  ;;  %v2478_v42 = vadd.f32 %v2465_v27, %v599_v15 }
 0x1fa   : > { %v948_v50 = vadd.f32 %v1401_v40, %v1398_v55  ;;  %v949_v7 = vadd.f32 %v1401_v40, %v1400_v0  ;;  %v871_v35 = vadd.f32 %v832_v17, %v2341_v57  ;;  %v874_v28 = vadd.f32 %v838_v10, %v2346_v24 }
 0x1fb   : > { %v2462_v57 = vadd.f32 %v599_v15, %v597_v21  ;;  %v2468_v55 = vadd.f32 %v600_v49, %v598_v14  ;;  %v525_v24 = vadd.f32 %v2411_v62, %v2253_v53  ;;  %v526_v40 = vadd.f32 %v2421_v30, %v2266_v23  ;;  %v2641_v23 = vld [vmem:[#allocation15_spill] sm:$0xff] }
 0x1fc   : > { %v960_v29 = vadd.f32 %v948_v50, %v946_v48  ;;  %v961_v32 = vadd.f32 %v949_v7, %v947_v58  ;;  %v1403_v20 = vadd.low.f32.bf16 %v871_v35, %v2397_v11 }
 0x1fd   : > { %v836_v33 = vpop.permute.xlu1 %835  ;;  %v842_v4 = vpop.permute.xlu0 %841 }
 0x1fe   : > { %v969_v5 = vadd.f32 %v961_v32, %v957_v45  ;;  %v950_v47 = vadd.f32 %v1403_v20, %v1400_v0  ;;  %v951_v51 = vadd.f32 %v1403_v20, %v1402_v9  ;;  %v873_v54 = vadd.f32 %v836_v33, %v2351_v60 }
 0x1ff   : > { %v1404_v45 = vadd.high.f32.bf16 %v874_v28, %v2399_v8  ;;  %v876_v38 = vadd.f32 %v842_v4, %v2356_v26  ;;  %v527_v26 = vadd.f32 %v2419_v43, %v2263_v19  ;;  %v2643_v28 = vld [vmem:[#allocation18_spill] sm:$0xff] }
 0x200   : > { %v962_v36 = vadd.f32 %v950_v47, %v948_v50  ;;  %v963_v11 = vadd.f32 %v951_v51, %v949_v7  ;;  %v977_v39 = vadd.f32 %v1403_v20, %v969_v5  ;;  %v1405_v37 = vadd.low.f32.bf16 %v873_v54, %v2399_v8 }
 0x201   : > { %v840_v3 = vpop.permute.xlu1 %839  ;;  %v550_v62 = vpop.permute.xlu0 %549  ;;  %v1406_v63 = vadd.high.f32.bf16 %v876_v38, %v2401_v13  ;;  %v529_v50 = vadd.f32 %v2423_v22, %v2273_v25 }
 0x202   : > { %v970_v60 = vadd.f32 %v962_v36, %v958_v12  ;;  %v985_v48 = vmax.f32 %v977_v39, 1.0  ;;  %v971_v58 = vadd.f32 %v963_v11, %v959_v56  ;;  %v952_v52 = vadd.f32 %v1405_v37, %v1402_v9 }
 0x203   : > { %v953_v16 = vadd.f32 %v1405_v37, %v1404_v45  ;;  %v875_v53 = vadd.f32 %v840_v3, %v2361_v61 }
 0x204   : > { %v978_v8 = vadd.f32 %v1402_v9, %v970_v60  ;;  %v979_v0 = vadd.f32 %v1405_v37, %v971_v58  ;;  %v964_v56 = vadd.f32 %v952_v52, %v950_v47  ;;  %1362 = vrcp.f32 %v985_v48 }
 0x205   : > { %v965_v18 = vadd.f32 %v953_v16, %v951_v51  ;;  %v1407_v6 = vadd.low.f32.bf16 %v875_v53, %v2401_v13  ;;  %v844_v12 = vpop.permute.xlu1 %843  ;;  %v846_v19 = vpop.permute.xlu0 %845  ;;  %v2640_v13 = vld [vmem:[#allocation16_spill] sm:$0xff]  ;;  %v589_v9 = vadd.f32 %v550_v62, %v525_v24  ;;  %v2644_v51 = vld [vmem:[#allocation17_spill] sm:$0xff] }
 0x206   : > { %v986_v61 = vmax.f32 %v978_v8, 1.0  ;;  %v877_v1 = vadd.f32 %v844_v12, %v2368_v46  ;;  %v972_v43 = vadd.f32 %v964_v56, %v960_v29  ;;  %v987_v7 = vmax.f32 %v979_v0, 1.0  ;;  %v2645_v8 = vld [vmem:[#allocation12_spill] sm:$0xff] }
 0x207   : > { %v954_v31 = vadd.f32 %v1407_v6, %v1404_v45  ;;  %v955_v44 = vadd.f32 %v1407_v6, %v1406_v63  ;;  %v973_v17 = vadd.f32 %v965_v18, %v961_v32  ;;  %v878_v30 = vadd.f32 %v846_v19, %v2641_v23  ;;  %v2642_v32 = vld [vmem:[#allocation11_spill] sm:$0xff]  ;;  %v2646_v0 = vld [vmem:[#allocation20_spill] sm:$0xff] }
 0x208   : > { %1364 = vrcp.f32 %v986_v61  ;;  %v1408_v35 = vadd.low.f32.bf16 %v877_v1, %v2640_v13  ;;  %v980_v20 = vadd.f32 %v1404_v45, %v972_v43  ;;  %v528_v29 = vadd.f32 %v2643_v28, %v2642_v32 }
 0x209   : > { %v966_v34 = vadd.f32 %v954_v31, %v952_v52  ;;  %v981_v15 = vadd.f32 %v1407_v6, %v973_v17  ;;  %v967_v49 = vadd.f32 %v955_v44, %v953_v16  ;;  %v548_v10 = vpop.permute.xlu1 %547  ;;  %v554_v22 = vpop.permute.xlu0 %553  ;;  %1366 = vrcp.f32 %v987_v7  ;;  %v2647_v44 = vld [vmem:[#allocation13_spill] sm:$0xff] }
 0x20a   : > { %v956_v46 = vadd.f32 %v1408_v35, %v1406_v63  ;;  %v588_v21 = vadd.f32 %v548_v10, %v524_v59  ;;  %v988_v47 = vmax.f32 %v980_v20, 1.0  ;;  %v1409_v24 = vadd.high.f32.bf16 %v878_v30, %v2640_v13 }
 0x20b   : > { %v974_v33 = vadd.f32 %v966_v34, %v962_v36  ;;  %v989_v14 = vmax.f32 %v981_v15, 1.0  ;;  %v975_v25 = vadd.f32 %v967_v49, %v963_v11  ;;  %v591_v60 = vadd.f32 %v554_v22, %v527_v26  ;;  %v2650_v22 = vld [vmem:[#allocation21_spill] sm:$0xff] }
 0x20c   : > { %v968_v5 = vadd.f32 %v956_v46, %v954_v31  ;;  %v603_v54 = vadd.f32 %v588_v21, %v2644_v51  ;;  %v604_v4 = vadd.f32 %v589_v9, %v588_v21  ;;  %1368 = vrcp.f32 %v988_v47 }
 0x20d   : > { %v982_v39 = vadd.f32 %v1406_v63, %v974_v33  ;;  %v983_v37 = vadd.f32 %v1408_v35, %v975_v25  ;;  %v552_v45 = vpop.permute.xlu1 %551  ;;  %v558_v58 = vpop.permute.xlu0 %557  ;;  %1370 = vrcp.f32 %v989_v14  ;;  %v531_v18 = vadd.f32 %v2646_v0, %v2645_v8  ;;  %v2649_v25 = vld [vmem:[#allocation14_spill] sm:$0xff] }
 0x20e   : > { %v976_v38 = vadd.f32 %v968_v5, %v964_v56  ;;  %v615_v3 = vadd.f32 %v603_v54, %v2465_v27  ;;  %v616_v36 = vadd.f32 %v604_v4, %v2417_v2  ;;  %v590_v48 = vadd.f32 %v552_v45, %v526_v40  ;;  %v1363_v52 = vpop.eup %1362 }
 0x20f   : > { %v990_v11 = vmax.f32 %v982_v39, 1.0  ;;  %v991_v59 = vmax.f32 %v983_v37, 1.0  ;;  %v593_v40 = vadd.f32 %v558_v58, %v529_v50  ;;  %v532_v5 = vadd.f32 %v2650_v22, %v2649_v25 }
 0x210   : > { %v984_v16 = vadd.f32 %v1409_v24, %v976_v38  ;;  %v623_v53 = vadd.f32 %v615_v3, %v2462_v57  ;;  %v624_v62 = vadd.f32 %v616_v36, %v2468_v55  ;;  %v605_v63 = vadd.f32 %v590_v48, %v589_v9  ;;  %v2648_v55 = vld [vmem:[#allocation19_spill] sm:$0xff] }
 0x211   : > { %1372 = vrcp.f32 %v990_v11  ;;  %v606_v27 = vadd.f32 %v591_v60, %v590_v48  ;;  %v556_v6 = vpop.permute.xlu1 %555  ;;  %v562_v57 = vpop.permute.xlu0 %561  ;;  %v530_v17 = vadd.f32 %v2648_v55, %v2647_v44 }
 0x212   : > { %v1365_v2 = vpop.eup %1364  ;;  %v992_v12 = vmax.f32 %v984_v16, 1.0  ;;  %v631_v56 = vadd.f32 %v623_v53, %v589_v9  ;;  %v632_v26 = vadd.f32 %v624_v62, %v590_v48  ;;  %1374 = vrcp.f32 %v991_v59 }
 0x213   : > { %v617_v61 = vadd.f32 %v605_v63, %v603_v54  ;;  %v618_v1 = vadd.f32 %v606_v27, %v604_v4  ;;  %v592_v31 = vadd.f32 %v556_v6, %v528_v29  ;;  %v595_v50 = vadd.f32 %v562_v57, %v531_v18  ;;  %v1367_v23 = vpop.eup %1366 }
 0x214   : > { %1376 = vrcp.f32 %v992_v12  ;;  %v1001_v19 = vmul.f32 %v1363_v52, %v631_v56  ;;  %v1002_v43 = vmul.f32 %v1365_v2, %v632_v26 }
 0x215   : > { %v625_v7 = vadd.f32 %v617_v61, %v2478_v42  ;;  %v626_v13 = vadd.f32 %v618_v1, %v2482_v41  ;;  %v607_v35 = vadd.f32 %v592_v31, %v591_v60  ;;  %v608_v34 = vadd.f32 %v593_v40, %v592_v31  ;;  %v560_v15 = vpop.permute.xlu1 %559 }
 0x216   : > { %1010 = vst.msk [vmem:[%s2511_s5] sm:$0xff] %vm1009_vm0, %v1001_v19  ;;  %1011 = vst.msk [vmem:[%s2511_s5 + $0x8] sm:$0xff] %vm1009_vm0, %v1002_v43  ;;  %v594_v49 = vadd.f32 %v560_v15, %v530_v17  ;;  %v1369_v9 = vpop.eup %1368 }
 0x217   : > { %v633_v30 = vadd.f32 %v625_v7, %v591_v60  ;;  %v619_v10 = vadd.f32 %v607_v35, %v605_v63  ;;  %v620_v42 = vadd.f32 %v608_v34, %v606_v27  ;;  %v634_v41 = vadd.f32 %v626_v13, %v592_v31  ;;  %v1371_v14 = vpop.eup %1370 }
 0x218   : > { %v609_v46 = vadd.f32 %v594_v49, %v593_v40  ;;  %v610_v20 = vadd.f32 %v595_v50, %v594_v49 }
 0x219   : > { %v1003_v21 = vmul.f32 %v1367_v23, %v633_v30  ;;  %v627_v32 = vadd.f32 %v619_v10, %v615_v3  ;;  %v1004_v28 = vmul.f32 %v1369_v9, %v634_v41  ;;  %v628_v29 = vadd.f32 %v620_v42, %v616_v36  ;;  %v564_v33 = vpop.permute.xlu1 %563 }
 0x21a   : > { %v621_v47 = vadd.f32 %v609_v46, %v607_v35  ;;  %v622_v51 = vadd.f32 %v610_v20, %v608_v34  ;;  %v596_v45 = vadd.f32 %v564_v33, %v532_v5 }
 0x21b   : > { %v1373_v54 = vpop.eup %1372  ;;  %1012 = vst.msk [vmem:[%s2511_s5 + $0x10] sm:$0xff] %vm1009_vm0, %v1003_v21  ;;  %v635_v4 = vadd.f32 %v627_v32, %v593_v40  ;;  %1013 = vst.msk [vmem:[%s2511_s5 + $0x18] sm:$0xff] %vm1009_vm0, %v1004_v28  ;;  %v636_v39 = vadd.f32 %v628_v29, %v594_v49 }
 0x21c   : > { %v629_v37 = vadd.f32 %v621_v47, %v617_v61  ;;  %v630_v24 = vadd.f32 %v622_v51, %v618_v1  ;;  %v1375_v38 = vpop.eup %1374 }
 0x21d   : > { %v1005_v3 = vmul.f32 %v1371_v14, %v635_v4  ;;  %v1006_v36 = vmul.f32 %v1373_v54, %v636_v39 }
 0x21e   : > { %v1377_v11 = vpop.eup %1376  ;;  %v637_v59 = vadd.f32 %v629_v37, %v595_v50  ;;  %v638_v60 = vadd.f32 %v630_v24, %v596_v45 }
 0x21f   : > { %1014 = vst.msk [vmem:[%s2511_s5 + $0x20] sm:$0xff] %vm1009_vm0, %v1005_v3  ;;  %1015 = vst.msk [vmem:[%s2511_s5 + $0x28] sm:$0xff] %vm1009_vm0, %v1006_v36 }
 0x220   : > { %v1007_v48 = vmul.f32 %v1375_v38, %v637_v59  ;;  %v1008_v58 = vmul.f32 %v1377_v11, %v638_v60 }
 0x222   : > { %1016 = vst.msk [vmem:[%s2511_s5 + $0x30] sm:$0xff] %vm1009_vm0, %v1007_v48  ;;  %1017 = vst.msk [vmem:[%s2511_s5 + $0x38] sm:$0xff] %vm1009_vm0, %v1008_v58 }
 0x223   : > { %1484 = shalt.err (!%p1481_p5)
}
 0x224   : > { %s1485_s28 = scalar_lea.hbm %s2532_s9, 1024  ;;  %s1489_s18 = scalar_lea.hbm %s2598_s2, 2048 }
 0x225   : > { %p1486_p2 = scmp.ne.s32.totalorder %s2532_s9, %s1485_s28  ;;  %p1490_p0 = scmp.lt.u32.totalorder %s2532_s9, %s2598_s2 }
 0x226   : > { %p1491_p3 = scmp.lt.u32.totalorder %s1489_s18, %s1485_s28  ;;  %p1493_p12 = scmp.lt.u32.totalorder %s1485_s28, %s2532_s9 }
 0x227   : > { %p1487_p9 = pnand %p1486_p2, %p2651_p4 }
 0x228   : > { %p1492_p10 = por %p1491_p3, %p1490_p0 }
 0x229   : > { %p1488_p13 = pneg %p1487_p9 }
 0x22a   : > { %p1494_p7 = por %p1493_p12, %p1492_p10 }
 0x22c   : > { %p1495_p6 = pnand %p1494_p7, %p1488_p13 }
 0x22e   : > { %1498 = shalt.err (!%p1495_p6)
}
 0x22f   : > { %s1593_s21 = smov 128   ;;  %s1594_s6 = smov 8  }
 0x230   : > { %1186 = dma.vmem_to_hbm [thread:$0]  (%p2651_p4), %s2534_s26, 1024, %s2532_s9, %s1019_s15, %s1593_s21, %s1593_s21, %s1594_s6  }
 0x231 PF: > { %s1048_s20 = sand.u32 1, %s1561_s12   ;;  %p2652_p1 = scmp.ne.s32.totalorder %s2617_s4, 0 }
 0x232   : > { %p2653_p11 = scmp.ge.s32.totalorder %s1581_s17, 2  ;;  %s1049_s3 = scalar_lea.sflag [#allocation4], %s1048_s20 }
 0x234   : > { %p1196_p8 = pnand %p2653_p11, %p2652_p1 }
 0x236   : > { %1544 = dma.done.wait (!%p1196_p8), %s1049_s3, 1024  }
 0x237   : > { %1546 = vsyncadd (!%p1196_p8), %s1049_s3, 4294966272  ;;  %s21_s17 = sadd.s32 1, %s1581_s17   ;;  %s2654_s9 = smov %s1553_s10 }
 0x238   : > { %p18_p5 = scmp.ge.s32.totalorder %s21_s17, 4   ;;  %s2655_s10 = smov %s1557_s11 }
 0x239   : > { %s2656_s11 = smov %s1773_s23  ;;  %s2657_s12 = smov %s1565_s13 }
 0x23a   : > { %s2658_s13 = smov %s1569_s14  ;;  %s2659_s14 = smov %s1694_s29 }
 0x23b   : > { %s2660_s15 = smov %s1577_s16  ;;  %s2661_s16 = smov %s1664_s22 }
 0x23c   :  { %20 = sbr.rel (!%p18_p5) target bundleno = 12 (0xc), region = 86 }
 0x243   :  { %1054 = vsyncpa [#allocation3], 1 }
 0x244   :  { %1056 = vsyncpa [#allocation3 + $0x1], 1 }
 0x245   :  { %1057 = vsyncpa [#allocation6], 1 }
 0x246   :  { %1059 = vsyncpa [#allocation6 + $0x1], 1 }
 0x247   :  { %1060 = vsyncpa [#allocation4], 1 }
 0x248   :  { %1062 = vsyncpa [#allocation4 + $0x1], 1 }

</bundles_post_ra>
